<compile_context>
chip_gen: v7x
topology: tpu7x:2x2x1
jax: 0.10.0
libtpu: 0.0.40
codegen_flags: <defaults>
</compile_context>

<pallas_src>
import functools

import jax
import jax.numpy as jnp
from jax.experimental import pallas as pl
from jax.experimental.pallas import tpu as pltpu


def _round_up(x, m):
    return ((x + m - 1) // m) * m


def _actor_kernel(max_action, x_ref, w1_ref, b1_ref, w2_ref, b2_ref,
                  w3_ref, b3_ref, o_ref):
    # Layer 1: relu(x @ W1 + b1)   (bf16 MXU, f32 accumulate)
    x = x_ref[...].astype(jnp.bfloat16)
    h1 = jnp.dot(x, w1_ref[...], preferred_element_type=jnp.float32)
    h1 = jnp.maximum(h1 + b1_ref[...], 0.0)
    # Layer 2: relu(h1 @ W2 + b2)
    h2 = jnp.dot(h1.astype(jnp.bfloat16), w2_ref[...],
                 preferred_element_type=jnp.float32)
    h2 = jnp.maximum(h2 + b2_ref[...], 0.0)
    # Layer 3: max_action * tanh(h2 @ W3 + b3)
    h3 = jnp.dot(h2.astype(jnp.bfloat16), w3_ref[...],
                 preferred_element_type=jnp.float32)
    h3 = h3 + b3_ref[...]
    o_ref[...] = (max_action * jnp.tanh(h3)).astype(o_ref.dtype)


def actor_forward(state, params, max_action, *, block_b=512):
    """state: [B, state_dim] float32. Returns [B, latent_dim] float32."""
    w1, b1, w2, b2, w3, b3 = params
    B, state_dim = state.shape
    h1_dim = w1.shape[1]
    h2_dim = w2.shape[1]
    latent_dim = w3.shape[1]

    # --- pad the output (lane) dimension to a multiple of 128 lanes --------
    latent_pad = _round_up(latent_dim, 128)
    if latent_pad != latent_dim:
        w3p = jnp.zeros((h2_dim, latent_pad), w3.dtype).at[:, :latent_dim].set(w3)
        b3p = jnp.zeros((1, latent_pad), b3.dtype).at[:, :latent_dim].set(b3)
    else:
        w3p, b3p = w3, b3

    # --- choose a batch tile and pad the batch to a multiple of it ---------
    # Big batches get 512-row tiles (fills MXU M-dim, amortizes per-step
    # overhead); tiny batches only pad up to 128 rows.
    tb = max(8, min(block_b, _round_up(B, 128)))
    b_pad = _round_up(B, tb)
    if b_pad != B:
        state_p = jnp.zeros((b_pad, state_dim), state.dtype).at[:B].set(state)
    else:
        state_p = state

    # --- dtype plumbing: bf16 weights for the MXU, f32 biases --------------
    w1b = w1.astype(jnp.bfloat16)
    w2b = w2.astype(jnp.bfloat16)
    w3b = w3p.astype(jnp.bfloat16)
    b1f = b1.astype(jnp.float32)
    b2f = b2.astype(jnp.float32)
    b3f = b3p.astype(jnp.float32)

    grid = (b_pad // tb,)

    cost = pl.CostEstimate(
        flops=2 * b_pad * (state_dim * h1_dim + h1_dim * h2_dim
                           + h2_dim * latent_pad),
        transcendentals=b_pad * latent_pad,
        bytes_accessed=(state_p.size * state_p.dtype.itemsize
                        + w1b.size * 2 + w2b.size * 2 + w3b.size * 2
                        + (b1f.size + b2f.size + b3f.size) * 4
                        + b_pad * latent_pad * 4),
    )

    kernel = functools.partial(_actor_kernel, float(max_action))

    resident = lambda a: pl.BlockSpec(a.shape, lambda i: (0, 0))

    out = pl.pallas_call(
        kernel,
        out_shape=jax.ShapeDtypeStruct((b_pad, latent_pad), jnp.float32),
        grid=grid,
        in_specs=[
            pl.BlockSpec((tb, state_dim), lambda i: (i, 0)),   # state tile
            resident(w1b), resident(b1f),                      # weights stay put
            resident(w2b), resident(b2f),
            resident(w3b), resident(b3f),
        ],
        out_specs=pl.BlockSpec((tb, latent_pad), lambda i: (i, 0)),
        compiler_params=pltpu.CompilerParams(
            dimension_semantics=("parallel",)),                # megacore on v7x
        cost_estimate=cost,
    )(state_p, w1b, b1f, w2b, b2f, w3b, b3f)

    return out[:B, :latent_dim]


def init_actor_params(key, state_dim, latent_dim, hidden=(256, 256)):
    """Deterministic synthetic init (uniform, like torch Linear default scale)."""
    ks = jax.random.split(key, 6)

    def linear(kw, kb, fan_in, fan_out):
        bound = 1.0 / jnp.sqrt(float(fan_in))
        w = jax.random.uniform(kw, (fan_in, fan_out), jnp.float32, -bound, bound)
        b = jax.random.uniform(kb, (1, fan_out), jnp.float32, -bound, bound)
        return w, b

    w1, b1 = linear(ks[0], ks[1], state_dim, hidden[0])
    w2, b2 = linear(ks[2], ks[3], hidden[0], hidden[1])
    w3, b3 = linear(ks[4], ks[5], hidden[1], latent_dim)
    return (w1, b1, w2, b2, w3, b3)


def _reference_forward(state, params, max_action):
    w1, b1, w2, b2, w3, b3 = params
    a = jnp.maximum(state @ w1 + b1, 0.0)
    a = jnp.maximum(a @ w2 + b2, 0.0)
    a = a @ w3 + b3
    return max_action * jnp.tanh(a)


if __name__ == "__main__":
    key = jax.random.PRNGKey(0)
    k_param, k_state = jax.random.split(key)

    batch = 8
    state_dim = 16
    latent_dim = 8
    max_action = 1.0

    params = init_actor_params(k_param, state_dim, latent_dim)
    state = jax.random.normal(k_state, (batch, state_dim), jnp.float32)

    out = actor_forward(state, params, max_action)
    out = jax.block_until_ready(out)

    ref = _reference_forward(state, params, max_action)
    assert out.shape == (batch, latent_dim)
    # bf16 matmuls (f32 accumulation): allow small deviation from f32 reference.
    assert jnp.allclose(out, ref, atol=2e-2, rtol=2e-2), "mismatch vs reference"

    print("KERNEL_OK")
</pallas_src>

<mosaic_0001>
module attributes {stable_mosaic.version = 11 : i64} {
  func.func @_actor_kernel(%arg0: i32, %arg1: memref<128x16xf32, #tpu.memory_space<vmem>>, %arg2: memref<16x256xbf16, #tpu.memory_space<vmem>>, %arg3: memref<1x256xf32, #tpu.memory_space<vmem>>, %arg4: memref<256x256xbf16, #tpu.memory_space<vmem>>, %arg5: memref<1x256xf32, #tpu.memory_space<vmem>>, %arg6: memref<256x128xbf16, #tpu.memory_space<vmem>>, %arg7: memref<1x128xf32, #tpu.memory_space<vmem>>, %arg8: memref<128x128xf32, #tpu.memory_space<vmem>>) attributes {dimension_semantics = [#tpu.dimension_semantics<parallel>], iteration_bounds = array<i64: 1>, scalar_prefetch = 0 : i64, scratch_operands = 0 : i64, tpu.core_type = #tpu.core_type<tc>, window_params = [{transform_indices = @transform_0, window_bounds = array<i64: 128, 16>}, {pipeline_mode = #tpu.pipeline_mode<synchronous>, transform_indices = @transform_1, window_bounds = array<i64: 16, 256>}, {pipeline_mode = #tpu.pipeline_mode<synchronous>, transform_indices = @transform_2, window_bounds = array<i64: 1, 256>}, {pipeline_mode = #tpu.pipeline_mode<synchronous>, transform_indices = @transform_3, window_bounds = array<i64: 256, 256>}, {pipeline_mode = #tpu.pipeline_mode<synchronous>, transform_indices = @transform_4, window_bounds = array<i64: 1, 256>}, {pipeline_mode = #tpu.pipeline_mode<synchronous>, transform_indices = @transform_5, window_bounds = array<i64: 256, 128>}, {pipeline_mode = #tpu.pipeline_mode<synchronous>, transform_indices = @transform_6, window_bounds = array<i64: 1, 128>}, {transform_indices = @transform_7, window_bounds = array<i64: 128, 128>}]} {
    %c0 = arith.constant 0 : index
    %c0_0 = arith.constant 0 : index
    %0 = vector.load %arg1[%c0, %c0_0] : memref<128x16xf32, #tpu.memory_space<vmem>>, vector<128x16xf32>
    %1 = arith.truncf %0 : vector<128x16xf32> to vector<128x16xbf16>
    %c0_1 = arith.constant 0 : index
    %c0_2 = arith.constant 0 : index
    %2 = vector.load %arg2[%c0_1, %c0_2] : memref<16x256xbf16, #tpu.memory_space<vmem>>, vector<16x256xbf16>
    %cst = arith.constant dense<0.000000e+00> : vector<128x256xf32>
    %3 = tpu.matmul %1, %2, %cst {dimension_numbers = #tpu.dot_dimension_numbers<[1], [0], [0], [1], [0, 0, 1, 1], [], []>} : vector<128x16xbf16>, vector<16x256xbf16>, vector<128x256xf32> -> vector<128x256xf32>
    %c0_3 = arith.constant 0 : index
    %c0_4 = arith.constant 0 : index
    %4 = vector.load %arg3[%c0_3, %c0_4] : memref<1x256xf32, #tpu.memory_space<vmem>>, vector<1x256xf32>
    %5 = vector.broadcast %4 : vector<1x256xf32> to vector<128x256xf32>
    %6 = arith.addf %3, %5 : vector<128x256xf32>
    %cst_5 = arith.constant 0.000000e+00 : f32
    %7 = vector.broadcast %cst_5 : f32 to vector<128x256xf32>
    %8 = arith.maximumf %6, %7 : vector<128x256xf32>
    %9 = arith.truncf %8 : vector<128x256xf32> to vector<128x256xbf16>
    %c0_6 = arith.constant 0 : index
    %c0_7 = arith.constant 0 : index
    %10 = vector.load %arg4[%c0_6, %c0_7] : memref<256x256xbf16, #tpu.memory_space<vmem>>, vector<256x256xbf16>
    %cst_8 = arith.constant dense<0.000000e+00> : vector<128x256xf32>
    %11 = tpu.matmul %9, %10, %cst_8 {dimension_numbers = #tpu.dot_dimension_numbers<[1], [0], [0], [1], [0, 0, 1, 1], [], []>} : vector<128x256xbf16>, vector<256x256xbf16>, vector<128x256xf32> -> vector<128x256xf32>
    %c0_9 = arith.constant 0 : index
    %c0_10 = arith.constant 0 : index
    %12 = vector.load %arg5[%c0_9, %c0_10] : memref<1x256xf32, #tpu.memory_space<vmem>>, vector<1x256xf32>
    %13 = vector.broadcast %12 : vector<1x256xf32> to vector<128x256xf32>
    %14 = arith.addf %11, %13 : vector<128x256xf32>
    %cst_11 = arith.constant 0.000000e+00 : f32
    %15 = vector.broadcast %cst_11 : f32 to vector<128x256xf32>
    %16 = arith.maximumf %14, %15 : vector<128x256xf32>
    %17 = arith.truncf %16 : vector<128x256xf32> to vector<128x256xbf16>
    %c0_12 = arith.constant 0 : index
    %c0_13 = arith.constant 0 : index
    %18 = vector.load %arg6[%c0_12, %c0_13] : memref<256x128xbf16, #tpu.memory_space<vmem>>, vector<256x128xbf16>
    %cst_14 = arith.constant dense<0.000000e+00> : vector<128x128xf32>
    %19 = tpu.matmul %17, %18, %cst_14 {dimension_numbers = #tpu.dot_dimension_numbers<[1], [0], [0], [1], [0, 0, 1, 1], [], []>} : vector<128x256xbf16>, vector<256x128xbf16>, vector<128x128xf32> -> vector<128x128xf32>
    %c0_15 = arith.constant 0 : index
    %c0_16 = arith.constant 0 : index
    %20 = vector.load %arg7[%c0_15, %c0_16] : memref<1x128xf32, #tpu.memory_space<vmem>>, vector<1x128xf32>
    %21 = vector.broadcast %20 : vector<1x128xf32> to vector<128x128xf32>
    %22 = arith.addf %19, %21 : vector<128x128xf32>
    %23 = math.tanh %22 : vector<128x128xf32>
    %cst_17 = arith.constant 1.000000e+00 : f32
    %24 = vector.broadcast %cst_17 : f32 to vector<128x128xf32>
    %25 = arith.mulf %24, %23 : vector<128x128xf32>
    %c0_18 = arith.constant 0 : index
    %c0_19 = arith.constant 0 : index
    %26 = vector.load %arg8[%c0_18, %c0_19] : memref<128x128xf32, #tpu.memory_space<vmem>>, vector<128x128xf32>
    tpu.vector_store %arg8[%c0_18, %c0_19], %25 {strides = array<i32>} : memref<128x128xf32, #tpu.memory_space<vmem>>, vector<128x128xf32>,
    return
  }
  func.func @transform_0(%arg0: i32) -> (i32, i32) {
    %c0_i32 = arith.constant 0 : i32
    %c0_i32_0 = arith.constant 0 : i32
    return %arg0, %c0_i32 : i32, i32
  }
  func.func @transform_1(%arg0: i32) -> (i32, i32) {
    %c0_i32 = arith.constant 0 : i32
    %c0_i32_0 = arith.constant 0 : i32
    %c0_i32_1 = arith.constant 0 : i32
    return %c0_i32, %c0_i32_0 : i32, i32
  }
  func.func @transform_2(%arg0: i32) -> (i32, i32) {
    %c0_i32 = arith.constant 0 : i32
    %c0_i32_0 = arith.constant 0 : i32
    %c0_i32_1 = arith.constant 0 : i32
    return %c0_i32, %c0_i32_0 : i32, i32
  }
  func.func @transform_3(%arg0: i32) -> (i32, i32) {
    %c0_i32 = arith.constant 0 : i32
    %c0_i32_0 = arith.constant 0 : i32
    %c0_i32_1 = arith.constant 0 : i32
    return %c0_i32, %c0_i32_0 : i32, i32
  }
  func.func @transform_4(%arg0: i32) -> (i32, i32) {
    %c0_i32 = arith.constant 0 : i32
    %c0_i32_0 = arith.constant 0 : i32
    %c0_i32_1 = arith.constant 0 : i32
    return %c0_i32, %c0_i32_0 : i32, i32
  }
  func.func @transform_5(%arg0: i32) -> (i32, i32) {
    %c0_i32 = arith.constant 0 : i32
    %c0_i32_0 = arith.constant 0 : i32
    %c0_i32_1 = arith.constant 0 : i32
    return %c0_i32, %c0_i32_0 : i32, i32
  }
  func.func @transform_6(%arg0: i32) -> (i32, i32) {
    %c0_i32 = arith.constant 0 : i32
    %c0_i32_0 = arith.constant 0 : i32
    %c0_i32_1 = arith.constant 0 : i32
    return %c0_i32, %c0_i32_0 : i32, i32
  }
  func.func @transform_7(%arg0: i32) -> (i32, i32) {
    %c0_i32 = arith.constant 0 : i32
    %c0_i32_0 = arith.constant 0 : i32
    return %arg0, %c0_i32 : i32, i32
  }
}

</mosaic_0001>

<bundles_post_ra>
// kernel: tpu_custom_call.1
= control target key start
LH: loop header
LB: loop body
LE: loop exit
PB: predicated region body
PF: predicated region fallthrough
CT: control target
= control target key end

     0   :  { %12 = vsyncpa [#allocation3], 0  ;;  %s1501_s0 = inlined_call_operand.vmem [shape: f32[128,16], index: 0, kind: input, shape index: {}]   ;;  %s1502_s1 = inlined_call_operand.vmem [shape: bf16[16,256], index: 1, kind: input, shape index: {}]   ;;  %s1503_s2 = inlined_call_operand.vmem [shape: f32[1,256], index: 2, kind: input, shape index: {}]   ;;  %s1504_s3 = inlined_call_operand.hbm [shape: bf16[256,256], index: 3, kind: input, shape index: {}]   ;;  %s1505_s4 = inlined_call_operand.vmem [shape: f32[1,256], index: 4, kind: input, shape index: {}]   ;;  %s1506_s5 = inlined_call_operand.vmem [shape: bf16[256,128], index: 5, kind: input, shape index: {}]   ;;  %s1507_s6 = inlined_call_operand.vmem [shape: f32[1,128], index: 6, kind: input, shape index: {}]   ;;  %s1508_s7 = inlined_call_operand.hbm [shape: f32[128,128], index: 7, kind: output, shape index: {}]  }
   0x1   :  { %13 = vsyncpa [#allocation4], 0  ;;  %s1197_s24 = smov [#allocation2]   ;;  %s1149_s28 = scalar_lea.hbm %s1504_s3, 4096 }
   0x2   :  { %s25_s25 = sshll.u32 %s1197_s24, 4  ;;  %p1150_p0 = scmp.ne.s32.totalorder %s1504_s3, %s1149_s28  ;;  %s26_s25 = int_to_ptr.vmem [resolvable:$true] %s25_s25 }
   0x3   :  { %p1153_p1 = scmp.lt.u32.totalorder %s1149_s28, %s1504_s3 }
   0x5   :  { %p1155_p2 = pnand %p1153_p1, %p1150_p0 }
   0x7   :  { %1158 = shalt.err (!%p1155_p2)
}
   0x8   :  { %s1159_s10 = scalar_lea.vmem %s26_s25, 4096  ;;  %p1164_p4 = scmp.lt.s32.totalorder %s26_s25, %s26_s25 }
   0x9   :  { %p1160_p3 = scmp.ne.s32.totalorder %s26_s25, %s1159_s10  ;;  %p1165_p5 = scmp.lt.s32.totalorder %s1159_s10, %s1159_s10 }
   0xb   :  { %p1166_p6 = por %p1165_p5, %p1164_p4 }
   0xd   :  { %p1167_p7 = pnand %p1166_p6, %p1160_p3 }
   0xf   :  { %1170 = shalt.err (!%p1167_p7)
}
  0x10   :  { %s1198_s11 = smov 128   ;;  %s1199_s12 = smov 8  }
  0x11   :  { %31 = dma.hbm_to_vmem [thread:$0]  %s1504_s3, 4096, %s26_s25, [#allocation3], %s1198_s11, %s1198_s11, %s1199_s12  }
  0x12   :  { %1193 = dma.done.wait [#allocation3], 4096  }
  0x13   :  { %1194 = vsyncadd [#allocation3], 4294963200  ;;  %v1200_v0 = vmov 0   ;;  %v1050_v1 = vld [vmem:[%s1502_s1 + $0x4] ss:$8 sps:$4 sm:$0xff]   ;;  %vm90_vm0 = vcmask 130048  }
  0x14   :  { %147 = vmatprep.mubr.bf16.mxu0 %v1200_v0  ;;  %v1052_v2 = vld [vmem:[%s1502_s1] ss:$8 sps:$4 sm:$0xff]   ;;  %115 = vmatprep.subr.bf16.mxu0 %v1050_v1  ;;  %v44_v6 = vld [vmem:[%s1501_s0 + $0x10] sm:$0xff]  ;;  %v45_v7 = vld [vmem:[%s1501_s0 + $0x18] sm:$0xff] }
  0x15   :  { %v42_v3 = vld [vmem:[%s1501_s0] sm:$0xff]  ;;  %v43_v4 = vld [vmem:[%s1501_s0 + $0x8] sm:$0xff]  ;;  %116 = vmatpush1.bf16.msra.mxu0 %v1052_v2  ;;  %v1056_v10 = vld [vmem:[#allocation2 + $0x14] ss:$8 sps:$4 sm:$0xff]   ;;  %v59_v11 = vpack.c.bf16 %v45_v7, %v44_v6 }
  0x16   :  { %v58_v5 = vpack.c.bf16 %v43_v4, %v42_v3  ;;  %v1053_v8 = vld [vmem:[#allocation2 + $0x4] ss:$8 sps:$4 sm:$0xff]   ;;  %v1055_v9 = vld [vmem:[#allocation2] ss:$8 sps:$4 sm:$0xff]   ;;  %v1058_v12 = vld [vmem:[#allocation2 + $0x10] ss:$8 sps:$4 sm:$0xff]  }
  0x17   :  { %480 = vmatprep.subr.bf16.mxu1 %v1053_v8  ;;  %v1059_v13 = vld [vmem:[#allocation2 + $0x24] ss:$8 sps:$4 sm:$0xff]   ;;  %v1061_v15 = vld [vmem:[#allocation2 + $0x20] ss:$8 sps:$4 sm:$0xff]   ;;  %v1062_v17 = vld [vmem:[#allocation2 + $0x34] ss:$8 sps:$4 sm:$0xff]  }
  0x18   :  { %924 = vmatmul.mubr.msk.bf16.vlgmr.msra.gmra.mrb[0].mxu0 %vm90_vm0, %v58_v5  ;;  %481 = vmatpush1.bf16.msra.mxu1 %v1055_v9  ;;  %v46_v14 = vld [vmem:[%s1501_s0 + $0x20] sm:$0xff]  ;;  %v47_v16 = vld [vmem:[%s1501_s0 + $0x28] sm:$0xff]  ;;  %v1064_v19 = vld [vmem:[#allocation2 + $0x30] ss:$8 sps:$4 sm:$0xff]   ;;  %v70_v9 = vlaneseq }
  0x19   :  { %157 = vmatprep.mubr.bf16.mxu0 %v1200_v0  ;;  %482 = vmatprep.subr.bf16.mxu1 %v1056_v10  ;;  %v60_v18 = vpack.c.bf16 %v47_v16, %v46_v14  ;;  %v1065_v20 = vld [vmem:[#allocation2 + $0x44] ss:$8 sps:$4 sm:$0xff]   ;;  %v48_v21 = vld [vmem:[%s1501_s0 + $0x30] sm:$0xff]  ;;  %v1067_v22 = vld [vmem:[#allocation2 + $0x40] ss:$8 sps:$4 sm:$0xff]  }
  0x1a   :  { %v49_v23 = vld [vmem:[%s1501_s0 + $0x38] sm:$0xff]  ;;  %v1071_v26 = vld [vmem:[#allocation2 + $0x64] ss:$8 sps:$4 sm:$0xff]   ;;  %v1073_v28 = vld [vmem:[#allocation2 + $0x60] ss:$8 sps:$4 sm:$0xff]   ;;  %v1369_v10 = vshrl.u32 %v70_v9, 7 }
  0x1b   :  { %v1068_v24 = vld [vmem:[#allocation2 + $0x54] ss:$8 sps:$4 sm:$0xff]   ;;  %v1070_v25 = vld [vmem:[#allocation2 + $0x50] ss:$8 sps:$4 sm:$0xff]   ;;  %v61_v27 = vpack.c.bf16 %v49_v23, %v48_v21  ;;  %v50_v29 = vld [vmem:[%s1501_s0 + $0x40] sm:$0xff] }
  0x1c   :  { %483 = vmatpush1.bf16.msra.mxu1 %v1058_v12  ;;  %v51_v30 = vld [vmem:[%s1501_s0 + $0x48] sm:$0xff]  ;;  %v1074_v31 = vld [vmem:[#allocation2 + $0x74] ss:$8 sps:$4 sm:$0xff]   ;;  %v1076_v32 = vld [vmem:[#allocation2 + $0x70] ss:$8 sps:$4 sm:$0xff]  }
  0x1d   :  { %484 = vmatprep.subr.bf16.mxu1 %v1059_v13  ;;  %v1077_v33 = vld [vmem:[#allocation2 + $0x84] ss:$8 sps:$4 sm:$0xff]   ;;  %v62_v34 = vpack.c.bf16 %v51_v30, %v50_v29  ;;  %v1079_v35 = vld [vmem:[#allocation2 + $0x80] ss:$8 sps:$4 sm:$0xff]   ;;  %v52_v36 = vld [vmem:[%s1501_s0 + $0x50] sm:$0xff]  ;;  %v76_v13 = vsub.s32 1, %v1369_v10 }
  0x1e   :  { %v53_v37 = vld [vmem:[%s1501_s0 + $0x58] sm:$0xff]  ;;  %v1083_v41 = vld [vmem:[#allocation2 + $0xa4] ss:$8 sps:$4 sm:$0xff]   ;;  %v1085_v42 = vld [vmem:[#allocation2 + $0xa0] ss:$8 sps:$4 sm:$0xff]  }
  0x1f   :  { %v1080_v38 = vld [vmem:[#allocation2 + $0x94] ss:$8 sps:$4 sm:$0xff]   ;;  %v63_v39 = vpack.c.bf16 %v53_v37, %v52_v36  ;;  %v1082_v40 = vld [vmem:[#allocation2 + $0x90] ss:$8 sps:$4 sm:$0xff]   ;;  %v54_v43 = vld [vmem:[%s1501_s0 + $0x60] sm:$0xff] }
  0x20   :  { %925 = vmatmul.mubr.msk.bf16.gmra.mrb[4].mxu0 %vm90_vm0, %v59_v11  ;;  %485 = vmatpush1.bf16.msra.mxu1 %v1061_v15  ;;  %v55_v44 = vld [vmem:[%s1501_s0 + $0x68] sm:$0xff]  ;;  %v1086_v45 = vld [vmem:[#allocation2 + $0xb4] ss:$8 sps:$4 sm:$0xff]   ;;  %v1088_v47 = vld [vmem:[#allocation2 + $0xb0] ss:$8 sps:$4 sm:$0xff]   ;;  %v72_v11 = vsub.s32 0, %v1369_v10 }
  0x21   :  { %167 = vmatprep.mubr.bf16.mxu0 %v1200_v0  ;;  %486 = vmatprep.subr.bf16.mxu1 %v1062_v17  ;;  %v64_v46 = vpack.c.bf16 %v55_v44, %v54_v43  ;;  %v1089_v48 = vld [vmem:[#allocation2 + $0xc4] ss:$8 sps:$4 sm:$0xff]   ;;  %v1091_v49 = vld [vmem:[#allocation2 + $0xc0] ss:$8 sps:$4 sm:$0xff]   ;;  %v56_v50 = vld [vmem:[%s1501_s0 + $0x70] sm:$0xff] }
  0x22   :  { %v57_v51 = vld [vmem:[%s1501_s0 + $0x78] sm:$0xff]  ;;  %v1095_v55 = vld [vmem:[#allocation2 + $0xe4] ss:$8 sps:$4 sm:$0xff]   ;;  %v1097_v56 = vld [vmem:[#allocation2 + $0xe0] ss:$8 sps:$4 sm:$0xff]  }
  0x23   :  { %v1092_v52 = vld [vmem:[#allocation2 + $0xd4] ss:$8 sps:$4 sm:$0xff]   ;;  %v65_v53 = vpack.c.bf16 %v57_v51, %v56_v50  ;;  %v1094_v54 = vld [vmem:[#allocation2 + $0xd0] ss:$8 sps:$4 sm:$0xff]   ;;  %v1101_v59 = vld [vmem:[%s1506_s5 + $0x40] sm:$0xff]  }
  0x24   :  { %487 = vmatpush1.bf16.msra.mxu1 %v1064_v19  ;;  %v1098_v57 = vld [vmem:[#allocation2 + $0xf4] ss:$8 sps:$4 sm:$0xff]   ;;  %v1100_v58 = vld [vmem:[#allocation2 + $0xf0] ss:$8 sps:$4 sm:$0xff]   ;;  %v1102_v60 = vld [vmem:[%s1506_s5] sm:$0xff]   ;;  %981 = vmatprep.subr.bf16.mxu0 %v1101_v59 }
  0x25   :  { %488 = vmatprep.subr.bf16.mxu1 %v1065_v20  ;;  %v1103_v61 = vld [vmem:[%s1506_s5 + $0x48] sm:$0xff]   ;;  %982 = vmatpush3.bf16.msra.mxu0 %v1102_v60  ;;  %v1105_v63 = vld [vmem:[%s1506_s5 + $0x50] sm:$0xff]   ;;  %v1107_v1 = vld [vmem:[%s1506_s5 + $0x58] sm:$0xff]  }
  0x26   :  { %v1104_v62 = vld [vmem:[%s1506_s5 + $0x8] sm:$0xff]   ;;  %983 = vmatprep.subr.bf16.mxu0 %v1103_v61  ;;  %v1108_v2 = vld [vmem:[%s1506_s5 + $0x18] sm:$0xff]   ;;  %v1109_v3 = vld [vmem:[%s1506_s5 + $0x60] sm:$0xff]  }
  0x27   :  { %v1110_v4 = vld [vmem:[%s1506_s5 + $0x20] sm:$0xff]   ;;  %v1111_v5 = vld [vmem:[%s1506_s5 + $0x68] sm:$0xff]   ;;  %v1113_v7 = vld [vmem:[%s1506_s5 + $0x70] sm:$0xff]  }
  0x28   :  { %926 = vmatmul.mubr.msk.bf16.gmra.mrb[8].mxu0 %vm90_vm0, %v60_v18  ;;  %489 = vmatpush1.bf16.msra.mxu1 %v1067_v22  ;;  %v1112_v6 = vld [vmem:[%s1506_s5 + $0x28] sm:$0xff]   ;;  %v1114_v8 = vld [vmem:[%s1506_s5 + $0x30] sm:$0xff]   ;;  %v68_v12 = vld [vmem:[%s1503_s2] sm:$0x3] }
  0x29   :  { %177 = vmatprep.mubr.bf16.mxu0 %v1200_v0  ;;  %490 = vmatprep.subr.bf16.mxu1 %v1068_v24  ;;  %v1378_v14 = vrot.slane %v68_v12, %v72_v11  ;;  %v1382_v15 = vrot.slane %v68_v12, %v76_v13 }
  0x2a   :  { %984 = vmatpush3.bf16.msra.mxu0 %v1104_v62 }
  0x2b   :  { %985 = vmatprep.subr.bf16.mxu0 %v1105_v63 }
  0x2c   :  { %491 = vmatpush1.bf16.msra.mxu1 %v1070_v25 }
  0x2d   :  { %492 = vmatprep.subr.bf16.mxu1 %v1071_v26 }
  0x30   :  { %927 = vmatmul.mubr.msk.bf16.gmra.mrb[12].mxu0 %vm90_vm0, %v61_v27  ;;  %493 = vmatpush1.bf16.msra.mxu1 %v1073_v28 }
  0x31   :  { %187 = vmatprep.mubr.bf16.mxu0 %v1200_v0  ;;  %494 = vmatprep.subr.bf16.mxu1 %v1074_v31 }
  0x34   :  { %495 = vmatpush1.bf16.msra.mxu1 %v1076_v32 }
  0x35   :  { %496 = vmatprep.subr.bf16.mxu1 %v1077_v33 }
  0x38   :  { %928 = vmatmul.mubr.msk.bf16.gmra.mrb[16].mxu0 %vm90_vm0, %v62_v34  ;;  %497 = vmatpush1.bf16.msra.mxu1 %v1079_v35 }
  0x39   :  { %197 = vmatprep.mubr.bf16.mxu0 %v1200_v0  ;;  %498 = vmatprep.subr.bf16.mxu1 %v1080_v38 }
  0x3c   :  { %499 = vmatpush1.bf16.msra.mxu1 %v1082_v40 }
  0x3d   :  { %500 = vmatprep.subr.bf16.mxu1 %v1083_v41 }
  0x40   :  { %929 = vmatmul.mubr.msk.bf16.gmra.mrb[20].mxu0 %vm90_vm0, %v63_v39  ;;  %501 = vmatpush1.bf16.msra.mxu1 %v1085_v42 }
  0x41   :  { %207 = vmatprep.mubr.bf16.mxu0 %v1200_v0  ;;  %502 = vmatprep.subr.bf16.mxu1 %v1086_v45 }
  0x44   :  { %503 = vmatpush1.bf16.msra.mxu1 %v1088_v47 }
  0x45   :  { %504 = vmatprep.subr.bf16.mxu1 %v1089_v48 }
  0x48   :  { %930 = vmatmul.mubr.msk.bf16.gmra.mrb[24].mxu0 %vm90_vm0, %v64_v46  ;;  %505 = vmatpush1.bf16.msra.mxu1 %v1091_v49 }
  0x49   :  { %217 = vmatprep.mubr.bf16.mxu0 %v1200_v0  ;;  %506 = vmatprep.subr.bf16.mxu1 %v1092_v52  ;;  %v1106_v0 = vld [vmem:[%s1506_s5 + $0x10] sm:$0xff]  }
  0x4a   :  { %986 = vmatpush3.bf16.msra.mxu0 %v1106_v0 }
  0x4b   :  { %987 = vmatprep.subr.bf16.mxu0 %v1107_v1 }
  0x4c   :  { %507 = vmatpush1.bf16.msra.mxu1 %v1094_v54 }
  0x4d   :  { %508 = vmatprep.subr.bf16.mxu1 %v1095_v55 }
  0x4e   :  { %988 = vmatpush3.bf16.msra.mxu0 %v1108_v2 }
  0x4f   :  { %989 = vmatprep.subr.bf16.mxu0 %v1109_v3 }
  0x50   :  { %931 = vmatmul.mubr.msk.bf16.gmra.mrb[28].mxu0 %vm90_vm0, %v65_v53  ;;  %509 = vmatpush1.bf16.msra.mxu1 %v1097_v56 }
  0x51   :  { %510 = vmatprep.subr.bf16.mxu1 %v1098_v57 }
  0x52   :  { %990 = vmatpush3.bf16.msra.mxu0 %v1110_v4 }
  0x53   :  { %991 = vmatprep.subr.bf16.mxu0 %v1111_v5 }
  0x54   :  { %511 = vmatpush1.bf16.msra.mxu1 %v1100_v58 }
  0x56   :  { %992 = vmatpush3.bf16.msra.mxu0 %v1112_v6 }
  0x57   :  { %993 = vmatprep.subr.bf16.mxu0 %v1113_v7 }
  0x5a   :  { %994 = vmatpush3.bf16.msra.mxu0 %v1114_v8 }
  0xeb   :  { %v149_v16 = vpop.f32.mrb[0].mxu0 }
  0xec   :  { %v150_v17 = vadd.f32 %v149_v16, %v1378_v14  ;;  %v151_v18 = vpop.f32.mrb[1].mxu0 }
  0xed   :  { %v152_v19 = vadd.f32 %v151_v18, %v1382_v15  ;;  %v153_v20 = vpop.f32.mrb[2].mxu0 }
  0xee   :  { %v154_v21 = vadd.f32 %v153_v20, %v1378_v14  ;;  %v155_v22 = vpop.f32.mrb[3].mxu0  ;;  %v228_v24 = vmax.f32 %v150_v17, 0.0 }
  0xef   :  { %v156_v23 = vadd.f32 %v155_v22, %v1382_v15  ;;  %v229_v26 = vmax.f32 %v152_v19, 0.0 }
  0xf0   :  { %v230_v25 = vmax.f32 %v154_v21, 0.0 }
  0xf1   :  { %v231_v27 = vmax.f32 %v156_v23, 0.0 }
  0xf2   :  { %v260_v28 = vpack.c.bf16 %v230_v25, %v228_v24 }
  0xf3   :  { %v159_v29 = vpop.f32.mrb[4].mxu0  ;;  %v261_v30 = vpack.c.bf16 %v231_v27, %v229_v26 }
  0xf4   :  { %v160_v31 = vadd.f32 %v159_v29, %v1378_v14  ;;  %v161_v32 = vpop.f32.mrb[5].mxu0 }
  0xf5   :  { %v162_v33 = vadd.f32 %v161_v32, %v1382_v15  ;;  %v163_v34 = vpop.f32.mrb[6].mxu0  ;;  %512 = vmatprep.mubr.bf16.mxu1 %v261_v30 }
  0xf6   :  { %v164_v35 = vadd.f32 %v163_v34, %v1378_v14  ;;  %v165_v36 = vpop.f32.mrb[7].mxu0  ;;  %513 = vmatmul.mubr.bf16.vlgmr.msra.gmra.mrb[0].mxu1 %v260_v28  ;;  %v232_v38 = vmax.f32 %v160_v31, 0.0 }
  0xf7   :  { %v166_v37 = vadd.f32 %v165_v36, %v1382_v15  ;;  %v233_v40 = vmax.f32 %v162_v33, 0.0 }
  0xf8   :  { %v234_v39 = vmax.f32 %v164_v35, 0.0 }
  0xf9   :  { %v235_v41 = vmax.f32 %v166_v37, 0.0 }
  0xfa   :  { %v262_v42 = vpack.c.bf16 %v234_v39, %v232_v38 }
  0xfb   :  { %v263_v43 = vpack.c.bf16 %v235_v41, %v233_v40  ;;  %v169_v44 = vpop.f32.mrb[8].mxu0 }
  0xfc   :  { %v170_v45 = vadd.f32 %v169_v44, %v1378_v14  ;;  %v171_v46 = vpop.f32.mrb[9].mxu0 }
  0xfd   :  { %v172_v47 = vadd.f32 %v171_v46, %v1382_v15  ;;  %v173_v48 = vpop.f32.mrb[10].mxu0  ;;  %522 = vmatprep.mubr.bf16.mxu1 %v263_v43 }
  0xfe   :  { %v174_v49 = vadd.f32 %v173_v48, %v1378_v14  ;;  %v175_v50 = vpop.f32.mrb[11].mxu0  ;;  %523 = vmatmul.mubr.bf16.gmra.mrb[4].mxu1 %v262_v42  ;;  %v236_v52 = vmax.f32 %v170_v45, 0.0 }
  0xff   :  { %v176_v51 = vadd.f32 %v175_v50, %v1382_v15  ;;  %v237_v54 = vmax.f32 %v172_v47, 0.0 }
 0x100   :  { %v238_v53 = vmax.f32 %v174_v49, 0.0 }
 0x101   :  { %v239_v55 = vmax.f32 %v176_v51, 0.0 }
 0x102   :  { %v264_v56 = vpack.c.bf16 %v238_v53, %v236_v52 }
 0x103   :  { %v265_v57 = vpack.c.bf16 %v239_v55, %v237_v54  ;;  %v179_v58 = vpop.f32.mrb[12].mxu0 }
 0x104   :  { %v180_v59 = vadd.f32 %v179_v58, %v1378_v14  ;;  %v181_v60 = vpop.f32.mrb[13].mxu0 }
 0x105   :  { %v182_v61 = vadd.f32 %v181_v60, %v1382_v15  ;;  %v183_v62 = vpop.f32.mrb[14].mxu0  ;;  %532 = vmatprep.mubr.bf16.mxu1 %v265_v57 }
 0x106   :  { %v184_v63 = vadd.f32 %v183_v62, %v1378_v14  ;;  %v185_v0 = vpop.f32.mrb[15].mxu0  ;;  %533 = vmatmul.mubr.bf16.gmra.mrb[8].mxu1 %v264_v56  ;;  %v240_v2 = vmax.f32 %v180_v59, 0.0 }
 0x107   :  { %v186_v1 = vadd.f32 %v185_v0, %v1382_v15  ;;  %v241_v4 = vmax.f32 %v182_v61, 0.0 }
 0x108   :  { %v242_v3 = vmax.f32 %v184_v63, 0.0 }
 0x109   :  { %v243_v5 = vmax.f32 %v186_v1, 0.0 }
 0x10a   :  { %v266_v6 = vpack.c.bf16 %v242_v3, %v240_v2 }
 0x10b   :  { %v267_v7 = vpack.c.bf16 %v243_v5, %v241_v4  ;;  %v189_v8 = vpop.f32.mrb[16].mxu0  ;;  %v1115_v5 = vld [vmem:[%s1506_s5 + $0x78] sm:$0xff]  }
 0x10c   :  { %v190_v9 = vadd.f32 %v189_v8, %v1378_v14  ;;  %v191_v12 = vpop.f32.mrb[17].mxu0  ;;  %995 = vmatprep.subr.bf16.mxu0 %v1115_v5 }
 0x10d   :  { %v192_v16 = vadd.f32 %v191_v12, %v1382_v15  ;;  %v193_v17 = vpop.f32.mrb[18].mxu0  ;;  %542 = vmatprep.mubr.bf16.mxu1 %v267_v7 }
 0x10e   :  { %v194_v18 = vadd.f32 %v193_v17, %v1378_v14  ;;  %v195_v19 = vpop.f32.mrb[19].mxu0  ;;  %543 = vmatmul.mubr.bf16.gmra.mrb[12].mxu1 %v266_v6  ;;  %v244_v21 = vmax.f32 %v190_v9, 0.0 }
 0x10f   :  { %v196_v20 = vadd.f32 %v195_v19, %v1382_v15  ;;  %v245_v23 = vmax.f32 %v192_v16, 0.0 }
 0x110   :  { %v246_v22 = vmax.f32 %v194_v18, 0.0 }
 0x111   :  { %v247_v24 = vmax.f32 %v196_v20, 0.0 }
 0x112   :  { %v268_v25 = vpack.c.bf16 %v246_v22, %v244_v21 }
 0x113   :  { %v269_v26 = vpack.c.bf16 %v247_v24, %v245_v23  ;;  %v199_v27 = vpop.f32.mrb[20].mxu0 }
 0x114   :  { %v200_v28 = vadd.f32 %v199_v27, %v1378_v14  ;;  %v201_v29 = vpop.f32.mrb[21].mxu0 }
 0x115   :  { %v202_v30 = vadd.f32 %v201_v29, %v1382_v15  ;;  %v203_v31 = vpop.f32.mrb[22].mxu0  ;;  %552 = vmatprep.mubr.bf16.mxu1 %v269_v26 }
 0x116   :  { %v204_v32 = vadd.f32 %v203_v31, %v1378_v14  ;;  %v205_v33 = vpop.f32.mrb[23].mxu0  ;;  %553 = vmatmul.mubr.bf16.gmra.mrb[16].mxu1 %v268_v25  ;;  %v248_v35 = vmax.f32 %v200_v28, 0.0 }
 0x117   :  { %v206_v34 = vadd.f32 %v205_v33, %v1382_v15  ;;  %v249_v37 = vmax.f32 %v202_v30, 0.0 }
 0x118   :  { %v250_v36 = vmax.f32 %v204_v32, 0.0 }
 0x119   :  { %v251_v38 = vmax.f32 %v206_v34, 0.0 }
 0x11a   :  { %v270_v39 = vpack.c.bf16 %v250_v36, %v248_v35 }
 0x11b   :  { %v271_v40 = vpack.c.bf16 %v251_v38, %v249_v37  ;;  %v209_v41 = vpop.f32.mrb[24].mxu0 }
 0x11c   :  { %v210_v42 = vadd.f32 %v209_v41, %v1378_v14  ;;  %v211_v43 = vpop.f32.mrb[25].mxu0 }
 0x11d   :  { %v212_v44 = vadd.f32 %v211_v43, %v1382_v15  ;;  %v213_v45 = vpop.f32.mrb[26].mxu0  ;;  %562 = vmatprep.mubr.bf16.mxu1 %v271_v40 }
 0x11e   :  { %v214_v46 = vadd.f32 %v213_v45, %v1378_v14  ;;  %v215_v47 = vpop.f32.mrb[27].mxu0  ;;  %563 = vmatmul.mubr.bf16.gmra.mrb[20].mxu1 %v270_v39  ;;  %v252_v49 = vmax.f32 %v210_v42, 0.0 }
 0x11f   :  { %v216_v48 = vadd.f32 %v215_v47, %v1382_v15  ;;  %v253_v51 = vmax.f32 %v212_v44, 0.0 }
 0x120   :  { %v254_v50 = vmax.f32 %v214_v46, 0.0 }
 0x121   :  { %v255_v52 = vmax.f32 %v216_v48, 0.0 }
 0x122   :  { %v272_v53 = vpack.c.bf16 %v254_v50, %v252_v49 }
 0x123   :  { %v273_v54 = vpack.c.bf16 %v255_v52, %v253_v51  ;;  %v219_v55 = vpop.f32.mrb[28].mxu0 }
 0x124   :  { %v220_v56 = vadd.f32 %v219_v55, %v1378_v14  ;;  %v221_v57 = vpop.f32.mrb[29].mxu0 }
 0x125   :  { %v222_v58 = vadd.f32 %v221_v57, %v1382_v15  ;;  %v223_v59 = vpop.f32.mrb[30].mxu0  ;;  %572 = vmatprep.mubr.bf16.mxu1 %v273_v54 }
 0x126   :  { %v224_v60 = vadd.f32 %v223_v59, %v1378_v14  ;;  %v225_v61 = vpop.f32.mrb[31].mxu0  ;;  %573 = vmatmul.mubr.bf16.gmra.mrb[24].mxu1 %v272_v53  ;;  %v256_v63 = vmax.f32 %v220_v56, 0.0  ;;  %v1116_v14 = vld [vmem:[%s1506_s5 + $0x38] sm:$0xff]  }
 0x127   :  { %v226_v62 = vadd.f32 %v225_v61, %v1382_v15  ;;  %v257_v1 = vmax.f32 %v222_v58, 0.0  ;;  %996 = vmatpush3.bf16.msra.mxu0 %v1116_v14  ;;  %v308_v15 = vld [vmem:[%s1505_s4] sm:$0x3] }
 0x128   :  { %v258_v0 = vmax.f32 %v224_v60, 0.0  ;;  %v1427_v6 = vrot.slane %v308_v15, %v72_v11  ;;  %v1431_v7 = vrot.slane %v308_v15, %v76_v13 }
 0x129   :  { %v259_v2 = vmax.f32 %v226_v62, 0.0 }
 0x12a   :  { %v274_v3 = vpack.c.bf16 %v258_v0, %v256_v63 }
 0x12b   :  { %v275_v4 = vpack.c.bf16 %v259_v2, %v257_v1 }
 0x12d   :  { %582 = vmatprep.mubr.bf16.mxu1 %v275_v4 }
 0x12e   :  { %583 = vmatmul.mubr.bf16.gmra.mrb[28].mxu1 %v274_v3 }
 0x1c9   :  { %v514_v8 = vpop.f32.mrb[0].mxu1 }
 0x1ca   :  { %v515_v9 = vadd.f32 %v514_v8, %v1427_v6  ;;  %v516_v12 = vpop.f32.mrb[1].mxu1 }
 0x1cb   :  { %v517_v16 = vadd.f32 %v516_v12, %v1431_v7  ;;  %v518_v17 = vpop.f32.mrb[2].mxu1 }
 0x1cc   :  { %v519_v18 = vadd.f32 %v518_v17, %v1427_v6  ;;  %v520_v19 = vpop.f32.mrb[3].mxu1  ;;  %v593_v21 = vmax.f32 %v515_v9, 0.0 }
 0x1cd   :  { %v521_v20 = vadd.f32 %v520_v19, %v1431_v7  ;;  %v594_v11 = vmax.f32 %v517_v16, 0.0 }
 0x1ce   :  { %v595_v22 = vmax.f32 %v519_v18, 0.0 }
 0x1cf   :  { %v596_v23 = vmax.f32 %v521_v20, 0.0 }
 0x1d0   :  { %v625_v24 = vpack.c.bf16 %v595_v22, %v593_v21 }
 0x1d1   :  { %v626_v10 = vpack.c.bf16 %v596_v23, %v594_v11  ;;  %v524_v13 = vpop.f32.mrb[4].mxu1 }
 0x1d2   :  { %v525_v25 = vadd.f32 %v524_v13, %v1427_v6  ;;  %v526_v26 = vpop.f32.mrb[5].mxu1 }
 0x1d3   :  { %v527_v27 = vadd.f32 %v526_v26, %v1431_v7  ;;  %v528_v28 = vpop.f32.mrb[6].mxu1  ;;  %808 = vmatprep.mubr.bf16.mxu0 %v626_v10 }
 0x1d4   :  { %v529_v29 = vadd.f32 %v528_v28, %v1427_v6  ;;  %v530_v30 = vpop.f32.mrb[7].mxu1  ;;  %809 = vmatmul.mubr.bf16.vlgmr.msra.gmra.mrb[32].mxu0 %v625_v24  ;;  %v597_v32 = vmax.f32 %v525_v25, 0.0 }
 0x1d5   :  { %v531_v31 = vadd.f32 %v530_v30, %v1431_v7  ;;  %v598_v34 = vmax.f32 %v527_v27, 0.0 }
 0x1d6   :  { %v599_v33 = vmax.f32 %v529_v29, 0.0 }
 0x1d7   :  { %v600_v35 = vmax.f32 %v531_v31, 0.0 }
 0x1d8   :  { %v627_v36 = vpack.c.bf16 %v599_v33, %v597_v32 }
 0x1d9   :  { %v628_v37 = vpack.c.bf16 %v600_v35, %v598_v34  ;;  %v534_v38 = vpop.f32.mrb[8].mxu1 }
 0x1da   :  { %v535_v39 = vadd.f32 %v534_v38, %v1427_v6  ;;  %v536_v40 = vpop.f32.mrb[9].mxu1 }
 0x1db   :  { %v537_v41 = vadd.f32 %v536_v40, %v1431_v7  ;;  %v538_v42 = vpop.f32.mrb[10].mxu1  ;;  %816 = vmatprep.mubr.bf16.mxu0 %v628_v37 }
 0x1dc   :  { %v539_v43 = vadd.f32 %v538_v42, %v1427_v6  ;;  %v540_v44 = vpop.f32.mrb[11].mxu1  ;;  %817 = vmatmul.mubr.bf16.gmra.mrb[36].mxu0 %v627_v36  ;;  %v601_v46 = vmax.f32 %v535_v39, 0.0 }
 0x1dd   :  { %v541_v45 = vadd.f32 %v540_v44, %v1431_v7  ;;  %v602_v48 = vmax.f32 %v537_v41, 0.0 }
 0x1de   :  { %v603_v47 = vmax.f32 %v539_v43, 0.0 }
 0x1df   :  { %v604_v49 = vmax.f32 %v541_v45, 0.0 }
 0x1e0   :  { %v629_v50 = vpack.c.bf16 %v603_v47, %v601_v46 }
 0x1e1   :  { %v630_v51 = vpack.c.bf16 %v604_v49, %v602_v48  ;;  %v544_v52 = vpop.f32.mrb[12].mxu1 }
 0x1e2   :  { %v545_v53 = vadd.f32 %v544_v52, %v1427_v6  ;;  %v546_v54 = vpop.f32.mrb[13].mxu1 }
 0x1e3   :  { %v547_v55 = vadd.f32 %v546_v54, %v1431_v7  ;;  %v548_v56 = vpop.f32.mrb[14].mxu1  ;;  %824 = vmatprep.mubr.bf16.mxu0 %v630_v51 }
 0x1e4   :  { %v549_v57 = vadd.f32 %v548_v56, %v1427_v6  ;;  %v550_v58 = vpop.f32.mrb[15].mxu1  ;;  %825 = vmatmul.mubr.bf16.gmra.mrb[40].mxu0 %v629_v50  ;;  %v605_v60 = vmax.f32 %v545_v53, 0.0 }
 0x1e5   :  { %v551_v59 = vadd.f32 %v550_v58, %v1431_v7  ;;  %v606_v62 = vmax.f32 %v547_v55, 0.0 }
 0x1e6   :  { %v607_v61 = vmax.f32 %v549_v57, 0.0 }
 0x1e7   :  { %v608_v63 = vmax.f32 %v551_v59, 0.0 }
 0x1e8   :  { %v631_v0 = vpack.c.bf16 %v607_v61, %v605_v60  ;;  %v1468_v61 = vld [vmem:[%s1507_s6] ss:$0 sm:$0xff]  ;;  %s1201_s6 = smov [#allocation5]  }
 0x1e9   :  { %v632_v1 = vpack.c.bf16 %v608_v63, %v606_v62  ;;  %v554_v2 = vpop.f32.mrb[16].mxu1  ;;  %s910_s15 = sshll.u32 %s1201_s6, 4  ;;  %s911_s15 = int_to_ptr.vmem [resolvable:$true] %s910_s15 }
 0x1ea   :  { %v555_v3 = vadd.f32 %v554_v2, %v1427_v6  ;;  %v556_v4 = vpop.f32.mrb[17].mxu1  ;;  %s1171_s16 = scalar_lea.vmem %s911_s15, 2048  ;;  %p1176_p9 = scmp.lt.s32.totalorder %s911_s15, %s911_s15 }
 0x1eb   :  { %v557_v5 = vadd.f32 %v556_v4, %v1431_v7  ;;  %v558_v14 = vpop.f32.mrb[18].mxu1  ;;  %832 = vmatprep.mubr.bf16.mxu0 %v632_v1  ;;  %p1172_p8 = scmp.ne.s32.totalorder %s911_s15, %s1171_s16  ;;  %p1177_p10 = scmp.lt.s32.totalorder %s1171_s16, %s1171_s16 }
 0x1ec   :  { %v559_v15 = vadd.f32 %v558_v14, %v1427_v6  ;;  %v560_v8 = vpop.f32.mrb[19].mxu1  ;;  %833 = vmatmul.mubr.bf16.gmra.mrb[44].mxu0 %v631_v0  ;;  %v609_v12 = vmax.f32 %v555_v3, 0.0 }
 0x1ed   :  { %v561_v9 = vadd.f32 %v560_v8, %v1431_v7  ;;  %v610_v17 = vmax.f32 %v557_v5, 0.0  ;;  %p1178_p11 = por %p1177_p10, %p1176_p9 }
 0x1ee   :  { %v611_v16 = vmax.f32 %v559_v15, 0.0 }
 0x1ef   :  { %v612_v18 = vmax.f32 %v561_v9, 0.0  ;;  %p1179_p12 = pnand %p1178_p11, %p1172_p8 }
 0x1f0   :  { %v633_v19 = vpack.c.bf16 %v611_v16, %v609_v12 }
 0x1f1   :  { %v634_v20 = vpack.c.bf16 %v612_v18, %v610_v17  ;;  %v564_v21 = vpop.f32.mrb[20].mxu1 }
 0x1f2   :  { %v565_v22 = vadd.f32 %v564_v21, %v1427_v6  ;;  %v566_v11 = vpop.f32.mrb[21].mxu1 }
 0x1f3   :  { %v567_v23 = vadd.f32 %v566_v11, %v1431_v7  ;;  %v568_v24 = vpop.f32.mrb[22].mxu1  ;;  %840 = vmatprep.mubr.bf16.mxu0 %v634_v20 }
 0x1f4   :  { %v569_v10 = vadd.f32 %v568_v24, %v1427_v6  ;;  %v570_v13 = vpop.f32.mrb[23].mxu1  ;;  %841 = vmatmul.mubr.bf16.gmra.mrb[48].mxu0 %v633_v19  ;;  %v613_v26 = vmax.f32 %v565_v22, 0.0 }
 0x1f5   :  { %v571_v25 = vadd.f32 %v570_v13, %v1431_v7  ;;  %v614_v28 = vmax.f32 %v567_v23, 0.0 }
 0x1f6   :  { %v615_v27 = vmax.f32 %v569_v10, 0.0 }
 0x1f7   :  { %v616_v29 = vmax.f32 %v571_v25, 0.0 }
 0x1f8   :  { %v635_v30 = vpack.c.bf16 %v615_v27, %v613_v26 }
 0x1f9   :  { %v636_v31 = vpack.c.bf16 %v616_v29, %v614_v28  ;;  %v574_v32 = vpop.f32.mrb[24].mxu1 }
 0x1fa   :  { %v575_v33 = vadd.f32 %v574_v32, %v1427_v6  ;;  %v576_v34 = vpop.f32.mrb[25].mxu1 }
 0x1fb   :  { %v577_v35 = vadd.f32 %v576_v34, %v1431_v7  ;;  %v578_v36 = vpop.f32.mrb[26].mxu1  ;;  %848 = vmatprep.mubr.bf16.mxu0 %v636_v31 }
 0x1fc   :  { %v579_v37 = vadd.f32 %v578_v36, %v1427_v6  ;;  %v580_v38 = vpop.f32.mrb[27].mxu1  ;;  %849 = vmatmul.mubr.bf16.gmra.mrb[52].mxu0 %v635_v30  ;;  %v617_v40 = vmax.f32 %v575_v33, 0.0 }
 0x1fd   :  { %v581_v39 = vadd.f32 %v580_v38, %v1431_v7  ;;  %v618_v42 = vmax.f32 %v577_v35, 0.0 }
 0x1fe   :  { %v619_v41 = vmax.f32 %v579_v37, 0.0 }
 0x1ff   :  { %v620_v43 = vmax.f32 %v581_v39, 0.0 }
 0x200   :  { %v637_v44 = vpack.c.bf16 %v619_v41, %v617_v40 }
 0x201   :  { %v638_v45 = vpack.c.bf16 %v620_v43, %v618_v42  ;;  %v584_v46 = vpop.f32.mrb[28].mxu1 }
 0x202   :  { %v585_v47 = vadd.f32 %v584_v46, %v1427_v6  ;;  %v586_v48 = vpop.f32.mrb[29].mxu1 }
 0x203   :  { %v587_v49 = vadd.f32 %v586_v48, %v1431_v7  ;;  %v588_v50 = vpop.f32.mrb[30].mxu1  ;;  %856 = vmatprep.mubr.bf16.mxu0 %v638_v45 }
 0x204   :  { %v589_v51 = vadd.f32 %v588_v50, %v1427_v6  ;;  %v590_v52 = vpop.f32.mrb[31].mxu1  ;;  %857 = vmatmul.mubr.bf16.gmra.mrb[56].mxu0 %v637_v44  ;;  %v621_v54 = vmax.f32 %v585_v47, 0.0 }
 0x205   :  { %v591_v53 = vadd.f32 %v590_v52, %v1431_v7  ;;  %v622_v56 = vmax.f32 %v587_v49, 0.0 }
 0x206   :  { %v623_v55 = vmax.f32 %v589_v51, 0.0 }
 0x207   :  { %v624_v57 = vmax.f32 %v591_v53, 0.0 }
 0x208   :  { %v639_v58 = vpack.c.bf16 %v623_v55, %v621_v54 }
 0x209   :  { %v640_v59 = vpack.c.bf16 %v624_v57, %v622_v56 }
 0x20b   :  { %864 = vmatprep.mubr.bf16.mxu0 %v640_v59 }
 0x20c   :  { %865 = vmatmul.mubr.bf16.gmra.mrb[60].mxu0 %v639_v58 }
 0x2a7   :  { %v997_v60 = vpop.f32.mrb[32].mxu0 }
 0x2a8   :  { %v998_v62 = vpop.f32.mrb[33].mxu0 }
 0x2a9   :  { %v999_v6 = vadd.f32 %v998_v62, %v997_v60  ;;  %v1000_v63 = vpop.f32.mrb[34].mxu0 }
 0x2aa   :  { %v1001_v0 = vpop.f32.mrb[35].mxu0 }
 0x2ab   :  { %v811_v7 = vadd.f32 %v999_v6, %v1468_v61  ;;  %v1002_v1 = vadd.f32 %v1001_v0, %v1000_v63 }
 0x2ad   :  { %1117 = vtanh.f32 %v811_v7  ;;  %v814_v2 = vadd.f32 %v1002_v1, %v1468_v61 }
 0x2af   :  { %1119 = vtanh.f32 %v814_v2  ;;  %v1003_v3 = vpop.f32.mrb[36].mxu0 }
 0x2b0   :  { %v1004_v4 = vpop.f32.mrb[37].mxu0 }
 0x2b1   :  { %v1005_v5 = vadd.f32 %v1004_v4, %v1003_v3  ;;  %v1006_v14 = vpop.f32.mrb[38].mxu0 }
 0x2b2   :  { %v1007_v15 = vpop.f32.mrb[39].mxu0 }
 0x2b3   :  { %v819_v8 = vadd.f32 %v1005_v5, %v1468_v61  ;;  %v1008_v9 = vadd.f32 %v1007_v15, %v1006_v14 }
 0x2b5   :  { %1121 = vtanh.f32 %v819_v8  ;;  %v822_v12 = vadd.f32 %v1008_v9, %v1468_v61 }
 0x2b7   :  { %v1118_v16 = vpop.eup %1117  ;;  %1123 = vtanh.f32 %v822_v12  ;;  %v1009_v17 = vpop.f32.mrb[40].mxu0 }
 0x2b8   :  { %889 = vst [vmem:[#allocation5] sm:$0xff] %v1118_v16  ;;  %v1010_v18 = vpop.f32.mrb[41].mxu0 }
 0x2b9   :  { %v1120_v19 = vpop.eup %1119  ;;  %v1011_v20 = vadd.f32 %v1010_v18, %v1009_v17  ;;  %v1012_v21 = vpop.f32.mrb[42].mxu0 }
 0x2ba   :  { %890 = vst [vmem:[#allocation5 + $0x8] sm:$0xff] %v1120_v19  ;;  %v1013_v22 = vpop.f32.mrb[43].mxu0 }
 0x2bb   :  { %v827_v11 = vadd.f32 %v1011_v20, %v1468_v61  ;;  %v1014_v23 = vadd.f32 %v1013_v22, %v1012_v21 }
 0x2bd   :  { %1125 = vtanh.f32 %v827_v11  ;;  %v830_v24 = vadd.f32 %v1014_v23, %v1468_v61 }
 0x2bf   :  { %v1122_v10 = vpop.eup %1121  ;;  %1127 = vtanh.f32 %v830_v24  ;;  %v1015_v13 = vpop.f32.mrb[44].mxu0 }
 0x2c0   :  { %891 = vst [vmem:[#allocation5 + $0x10] sm:$0xff] %v1122_v10  ;;  %v1016_v25 = vpop.f32.mrb[45].mxu0 }
 0x2c1   :  { %v1124_v26 = vpop.eup %1123  ;;  %v1017_v27 = vadd.f32 %v1016_v25, %v1015_v13  ;;  %v1018_v28 = vpop.f32.mrb[46].mxu0 }
 0x2c2   :  { %892 = vst [vmem:[#allocation5 + $0x18] sm:$0xff] %v1124_v26  ;;  %v1019_v29 = vpop.f32.mrb[47].mxu0 }
 0x2c3   :  { %v835_v30 = vadd.f32 %v1017_v27, %v1468_v61  ;;  %v1020_v31 = vadd.f32 %v1019_v29, %v1018_v28 }
 0x2c5   :  { %1129 = vtanh.f32 %v835_v30  ;;  %v838_v32 = vadd.f32 %v1020_v31, %v1468_v61 }
 0x2c7   :  { %v1126_v33 = vpop.eup %1125  ;;  %1131 = vtanh.f32 %v838_v32  ;;  %v1021_v34 = vpop.f32.mrb[48].mxu0 }
 0x2c8   :  { %893 = vst [vmem:[#allocation5 + $0x20] sm:$0xff] %v1126_v33  ;;  %v1022_v35 = vpop.f32.mrb[49].mxu0 }
 0x2c9   :  { %v1128_v36 = vpop.eup %1127  ;;  %v1023_v37 = vadd.f32 %v1022_v35, %v1021_v34  ;;  %v1024_v38 = vpop.f32.mrb[50].mxu0 }
 0x2ca   :  { %894 = vst [vmem:[#allocation5 + $0x28] sm:$0xff] %v1128_v36  ;;  %v1025_v39 = vpop.f32.mrb[51].mxu0 }
 0x2cb   :  { %v843_v40 = vadd.f32 %v1023_v37, %v1468_v61  ;;  %v1026_v41 = vadd.f32 %v1025_v39, %v1024_v38 }
 0x2cd   :  { %1133 = vtanh.f32 %v843_v40  ;;  %v846_v42 = vadd.f32 %v1026_v41, %v1468_v61 }
 0x2cf   :  { %v1130_v43 = vpop.eup %1129  ;;  %1135 = vtanh.f32 %v846_v42  ;;  %v1027_v44 = vpop.f32.mrb[52].mxu0 }
 0x2d0   :  { %895 = vst [vmem:[#allocation5 + $0x30] sm:$0xff] %v1130_v43  ;;  %v1028_v45 = vpop.f32.mrb[53].mxu0 }
 0x2d1   :  { %v1132_v46 = vpop.eup %1131  ;;  %v1029_v47 = vadd.f32 %v1028_v45, %v1027_v44  ;;  %v1030_v48 = vpop.f32.mrb[54].mxu0 }
 0x2d2   :  { %896 = vst [vmem:[#allocation5 + $0x38] sm:$0xff] %v1132_v46  ;;  %v1031_v49 = vpop.f32.mrb[55].mxu0 }
 0x2d3   :  { %v851_v50 = vadd.f32 %v1029_v47, %v1468_v61  ;;  %v1032_v51 = vadd.f32 %v1031_v49, %v1030_v48 }
 0x2d5   :  { %1137 = vtanh.f32 %v851_v50  ;;  %v854_v52 = vadd.f32 %v1032_v51, %v1468_v61 }
 0x2d7   :  { %v1134_v53 = vpop.eup %1133  ;;  %1139 = vtanh.f32 %v854_v52  ;;  %v1033_v54 = vpop.f32.mrb[56].mxu0 }
 0x2d8   :  { %897 = vst [vmem:[#allocation5 + $0x40] sm:$0xff] %v1134_v53  ;;  %v1034_v55 = vpop.f32.mrb[57].mxu0 }
 0x2d9   :  { %v1136_v56 = vpop.eup %1135  ;;  %v1035_v57 = vadd.f32 %v1034_v55, %v1033_v54  ;;  %v1036_v58 = vpop.f32.mrb[58].mxu0 }
 0x2da   :  { %898 = vst [vmem:[#allocation5 + $0x48] sm:$0xff] %v1136_v56  ;;  %v1037_v59 = vpop.f32.mrb[59].mxu0 }
 0x2db   :  { %v859_v60 = vadd.f32 %v1035_v57, %v1468_v61  ;;  %v1038_v62 = vadd.f32 %v1037_v59, %v1036_v58 }
 0x2dd   :  { %1141 = vtanh.f32 %v859_v60  ;;  %v862_v6 = vadd.f32 %v1038_v62, %v1468_v61 }
 0x2df   :  { %v1138_v63 = vpop.eup %1137  ;;  %1143 = vtanh.f32 %v862_v6  ;;  %v1039_v0 = vpop.f32.mrb[60].mxu0 }
 0x2e0   :  { %899 = vst [vmem:[#allocation5 + $0x50] sm:$0xff] %v1138_v63  ;;  %v1040_v7 = vpop.f32.mrb[61].mxu0 }
 0x2e1   :  { %v1140_v1 = vpop.eup %1139  ;;  %v1041_v2 = vadd.f32 %v1040_v7, %v1039_v0  ;;  %v1042_v3 = vpop.f32.mrb[62].mxu0 }
 0x2e2   :  { %900 = vst [vmem:[#allocation5 + $0x58] sm:$0xff] %v1140_v1  ;;  %v1043_v4 = vpop.f32.mrb[63].mxu0 }
 0x2e3   :  { %v867_v5 = vadd.f32 %v1041_v2, %v1468_v61  ;;  %v1044_v14 = vadd.f32 %v1043_v4, %v1042_v3 }
 0x2e5   :  { %1145 = vtanh.f32 %v867_v5  ;;  %v870_v15 = vadd.f32 %v1044_v14, %v1468_v61 }
 0x2e7   :  { %v1142_v8 = vpop.eup %1141  ;;  %1147 = vtanh.f32 %v870_v15 }
 0x2e8   :  { %901 = vst [vmem:[#allocation5 + $0x60] sm:$0xff] %v1142_v8 }
 0x2e9   :  { %v1144_v9 = vpop.eup %1143 }
 0x2ea   :  { %902 = vst [vmem:[#allocation5 + $0x68] sm:$0xff] %v1144_v9 }
 0x2ef   :  { %v1146_v12 = vpop.eup %1145 }
 0x2f0   :  { %903 = vst [vmem:[#allocation5 + $0x70] sm:$0xff] %v1146_v12 }
 0x2f1   :  { %v1148_v16 = vpop.eup %1147 }
 0x2f2   :  { %904 = vst [vmem:[#allocation5 + $0x78] sm:$0xff] %v1148_v16 }
 0x2f3   :  { %1182 = shalt.err (!%p1179_p12)
}
 0x2f4   :  { %s1183_s19 = scalar_lea.hbm %s1508_s7, 2048 }
 0x2f5   :  { %p1184_p13 = scmp.ne.s32.totalorder %s1508_s7, %s1183_s19  ;;  %p1187_p0 = scmp.lt.u32.totalorder %s1183_s19, %s1508_s7 }
 0x2f7   :  { %p1189_p1 = pnand %p1187_p0, %p1184_p13 }
 0x2f9   :  { %1192 = shalt.err (!%p1189_p1)
}
 0x2fa   :  { %916 = dma.vmem_to_hbm [thread:$0]  %s911_s15, 2048, %s1508_s7, [#allocation4], %s1198_s11, %s1198_s11, %s1199_s12  }
 0x2fb   :  { %1195 = dma.done.wait [#allocation4], 2048  }
 0x2fc   :  { %1196 = vsyncadd [#allocation4], 4294965248 }
 0x2fd   :  { %920 = vsyncpa [#allocation3], 1 }
 0x2fe   :  { %921 = vsyncpa [#allocation4], 1 }

</bundles_post_ra>
